<compile_context>
chip_gen: v5e
topology: v5e:2x2
jax: 0.10.0
libtpu: 0.0.40
codegen_flags: <defaults>
</compile_context>

<pallas_src>
import math

import jax
import jax.numpy as jnp
import numpy as np
from jax.experimental import pallas as pl
from jax.experimental.pallas import tpu as pltpu


def get_kernel_num(C, gamma=2, b=1):
    t = math.log2(C) / gamma + b / gamma
    floor = math.floor(t)
    return floor + (1 - floor % 2)


def _channel_attention_kernel(scalars_ref, x_ref, wmat_t_ref, o_ref):
    # scalars_ref: SMEM f32[3] = [0.5 + alpha, 0.5 + beta, conv_bias]
    # x_ref:       VMEM (TB, C, HW)
    # wmat_t_ref:  VMEM (C, C)  transposed banded-Toeplitz matrix of the conv
    # o_ref:       VMEM (1, TB, C)
    x = x_ref[...].astype(jnp.float32)                       # (TB, C, HW)
    hw = x.shape[-1]

    # AdaptiveAvgPool2d(1) / AdaptiveMaxPool2d(1) over the flattened spatial axis.
    f_avg = jnp.sum(x, axis=-1) * (1.0 / hw)                 # (TB, C)
    f_max = jnp.max(x, axis=-1)                              # (TB, C)

    alpha_p = scalars_ref[0]   # 0.5 + alpha
    beta_p = scalars_ref[1]    # 0.5 + beta
    bias = scalars_ref[2]

    f_add = alpha_p * f_avg + beta_p * f_max                 # (TB, C)

    # conv1d over the channel axis, batched over TB rows:
    # conv[b, c] = sum_j f_add[b, j] * w[j - c + pad]
    conv = jnp.dot(f_add, wmat_t_ref[...],
                   preferred_element_type=jnp.float32) + bias  # (TB, C)

    o_ref[0] = jax.nn.sigmoid(conv).astype(o_ref.dtype)


def _choose_batch_tile(B, C, HW, itemsize, target_bytes=4 << 20):
    """Largest batch tile <= ~target_bytes, keeping >= 2 grid steps when possible."""
    tb = max(1, target_bytes // (C * HW * itemsize))
    if B >= 2:
        tb = min(tb, pl.cdiv(B, 2))   # keep >=2 parallel grid steps (v7x 2 TCs)
    return int(min(tb, B))


def channel_attention(x, conv_w, conv_b, alpha, beta):
    """x: (B, C, H, W) float32 -> (B, C, 1, 1) float32."""
    B, C, H, W = x.shape
    HW = H * W
    k = conv_w.shape[0]
    pad = k // 2

    tb = _choose_batch_tile(B, C, HW, x.dtype.itemsize)
    grid = pl.cdiv(B, tb)
    b_pad = grid * tb

    x_flat = x.reshape(B, C, HW)
    if b_pad != B:
        x_flat = jnp.pad(x_flat, ((0, b_pad - B), (0, 0), (0, 0)))

    # Transposed banded-Toeplitz matrix of the 1-D cross-correlation with zero
    # padding k//2:  wmat_t[j, c] = conv_w[j - c + pad] when in-band, else 0.
    rows = jnp.arange(C)[:, None]   # j (contraction axis)
    cols = jnp.arange(C)[None, :]   # c (output channel)
    off = rows - cols + pad
    valid = (off >= 0) & (off < k)
    wmat_t = jnp.where(valid, conv_w[jnp.clip(off, 0, k - 1)], 0.0).astype(jnp.float32)

    # Fold the 0.5*(avg+max) term into alpha/beta.
    scalars = jnp.stack([
        0.5 + jnp.asarray(alpha, jnp.float32).reshape(()),
        0.5 + jnp.asarray(beta, jnp.float32).reshape(()),
        jnp.asarray(conv_b, jnp.float32).reshape(()),
    ])

    out = pl.pallas_call(
        _channel_attention_kernel,
        out_shape=jax.ShapeDtypeStruct((grid, tb, C), x.dtype),
        grid=(grid,),
        in_specs=[
            pl.BlockSpec(memory_space=pltpu.MemorySpace.SMEM),       # scalars
            pl.BlockSpec((tb, C, HW), lambda i: (i, 0, 0)),          # x slab
            pl.BlockSpec((C, C), lambda i: (0, 0)),                  # conv matrix
        ],
        out_specs=pl.BlockSpec((1, tb, C), lambda i: (i, 0, 0)),
        compiler_params=pltpu.CompilerParams(
            dimension_semantics=("parallel",)),
    )(scalars, x_flat, wmat_t)

    out = out.reshape(b_pad, C)[:B]
    return out.reshape(B, C, 1, 1)


def channel_attention_reference(x, conv_w, conv_b, alpha, beta):
    """Pure-JAX reference matching the PyTorch forward exactly."""
    f_avg = jnp.mean(x, axis=(2, 3), keepdims=True)
    f_max = jnp.max(x, axis=(2, 3), keepdims=True)
    f_add = 0.5 * (f_avg + f_max) + alpha * f_avg + beta * f_max     # (B,C,1,1)
    seq = f_add[..., 0, 0]                                           # (B, C)
    k = conv_w.shape[0]
    pad = k // 2
    padded = jnp.pad(seq, ((0, 0), (pad, pad)))
    out = jnp.zeros_like(seq)
    for j in range(k):
        out = out + conv_w[j] * padded[:, j:j + seq.shape[1]]
    out = out + conv_b
    return jax.nn.sigmoid(out)[..., None, None]


if __name__ == "__main__":
    B, C, H, W = 2, 16, 16, 16
    k = get_kernel_num(C)          # C=16 -> k=3

    key = jax.random.PRNGKey(0)
    kx, kw, kb = jax.random.split(key, 3)

    x = jax.random.normal(kx, (B, C, H, W), dtype=jnp.float32)

    # Deterministic parameter init (PyTorch Conv1d default: U(-1/sqrt(k), 1/sqrt(k))).
    bound = 1.0 / math.sqrt(k)
    conv_w = jax.random.uniform(kw, (k,), jnp.float32, -bound, bound)
    conv_b = jax.random.uniform(kb, (), jnp.float32, -bound, bound)
    alpha = jnp.float32(0.5)
    beta = jnp.float32(0.5)

    out = channel_attention(x, conv_w, conv_b, alpha, beta)
    out = jax.block_until_ready(out)

    ref = channel_attention_reference(x, conv_w, conv_b, alpha, beta)
    assert out.shape == (B, C, 1, 1)
    np.testing.assert_allclose(np.asarray(out), np.asarray(ref),
                               rtol=1e-5, atol=1e-5)
    print("KERNEL_OK")
</pallas_src>

<mosaic_0001>
module attributes {stable_mosaic.version = 11 : i64} {
  func.func @_channel_attention_kernel(%arg0: i32, %arg1: memref<3xf32, #tpu.memory_space<smem>>, %arg2: memref<1x16x256xf32, #tpu.memory_space<vmem>>, %arg3: memref<16x16xf32, #tpu.memory_space<vmem>>, %arg4: memref<1x1x16xf32, #tpu.memory_space<vmem>>) attributes {dimension_semantics = [#tpu.dimension_semantics<parallel>], iteration_bounds = array<i64: 2>, scalar_prefetch = 0 : i64, scratch_operands = 0 : i64, tpu.core_type = #tpu.core_type<tc>, window_params = [{transform_indices = @transform_0, window_bounds = array<i64: 3>}, {transform_indices = @transform_1, window_bounds = array<i64: 1, 16, 256>}, {pipeline_mode = #tpu.pipeline_mode<synchronous>, transform_indices = @transform_2, window_bounds = array<i64: 16, 16>}, {transform_indices = @transform_3, window_bounds = array<i64: 1, 1, 16>}]} {
    %c0 = arith.constant 0 : index
    %c0_0 = arith.constant 0 : index
    %c0_1 = arith.constant 0 : index
    %0 = vector.load %arg2[%c0, %c0_0, %c0_1] : memref<1x16x256xf32, #tpu.memory_space<vmem>>, vector<1x16x256xf32>
    %cst = arith.constant dense<0.000000e+00> : vector<1x16xf32>
    %1 = vector.multi_reduction <add>, %0, %cst [2] : vector<1x16x256xf32> to vector<1x16xf32>
    %cst_2 = arith.constant 3.906250e-03 : f32
    %2 = vector.broadcast %cst_2 : f32 to vector<1x16xf32>
    %3 = arith.mulf %1, %2 : vector<1x16xf32>
    %cst_3 = arith.constant dense<0xFF800000> : vector<1x16xf32>
    %4 = vector.multi_reduction <maximumf>, %0, %cst_3 [2] : vector<1x16x256xf32> to vector<1x16xf32>
    %c0_4 = arith.constant 0 : index
    %5 = memref.load %arg1[%c0_4] : memref<3xf32, #tpu.memory_space<smem>>
    %c1 = arith.constant 1 : index
    %6 = memref.load %arg1[%c1] : memref<3xf32, #tpu.memory_space<smem>>
    %c2 = arith.constant 2 : index
    %7 = memref.load %arg1[%c2] : memref<3xf32, #tpu.memory_space<smem>>
    %8 = vector.broadcast %5 : f32 to vector<1x16xf32>
    %9 = arith.mulf %8, %3 : vector<1x16xf32>
    %10 = vector.broadcast %6 : f32 to vector<1x16xf32>
    %11 = arith.mulf %10, %4 : vector<1x16xf32>
    %12 = arith.addf %9, %11 : vector<1x16xf32>
    %c0_5 = arith.constant 0 : index
    %c0_6 = arith.constant 0 : index
    %13 = vector.load %arg3[%c0_5, %c0_6] : memref<16x16xf32, #tpu.memory_space<vmem>>, vector<16x16xf32>
    %cst_7 = arith.constant dense<0.000000e+00> : vector<1x16xf32>
    %14 = tpu.matmul %12, %13, %cst_7 {dimension_numbers = #tpu.dot_dimension_numbers<[1], [0], [0], [1], [0, 0, 1, 1], [], []>} : vector<1x16xf32>, vector<16x16xf32>, vector<1x16xf32> -> vector<1x16xf32>
    %15 = vector.broadcast %7 : f32 to vector<1x16xf32>
    %16 = arith.addf %14, %15 : vector<1x16xf32>
    %17 = arith.negf %16 : vector<1x16xf32>
    %18 = math.exp %17 : vector<1x16xf32>
    %cst_8 = arith.constant 1.000000e+00 : f32
    %19 = vector.broadcast %cst_8 : f32 to vector<1x16xf32>
    %20 = arith.addf %19, %18 : vector<1x16xf32>
    %21 = arith.divf %19, %20 : vector<1x16xf32>
    %c0_9 = arith.constant 0 : index
    %c0_10 = arith.constant 0 : index
    %c0_11 = arith.constant 0 : index
    %22 = vector.load %arg4[%c0_9, %c0_10, %c0_11] : memref<1x1x16xf32, #tpu.memory_space<vmem>>, vector<1x1x16xf32>
    %23 = vector.shape_cast %22 : vector<1x1x16xf32> to vector<1x16xf32>
    %24 = vector.shape_cast %21 : vector<1x16xf32> to vector<1x1x16xf32>
    tpu.vector_store %arg4[%c0_9, %c0_10, %c0_11], %24 {strides = array<i32>} : memref<1x1x16xf32, #tpu.memory_space<vmem>>, vector<1x1x16xf32>,
    return
  }
  func.func @transform_0(%arg0: i32) -> i32 {
    %c0_i32 = arith.constant 0 : i32
    %c0_i32_0 = arith.constant 0 : i32
    return %c0_i32 : i32
  }
  func.func @transform_1(%arg0: i32) -> (i32, i32, i32) {
    %c0_i32 = arith.constant 0 : i32
    %c0_i32_0 = arith.constant 0 : i32
    %c0_i32_1 = arith.constant 0 : i32
    return %arg0, %c0_i32, %c0_i32_0 : i32, i32, i32
  }
  func.func @transform_2(%arg0: i32) -> (i32, i32) {
    %c0_i32 = arith.constant 0 : i32
    %c0_i32_0 = arith.constant 0 : i32
    %c0_i32_1 = arith.constant 0 : i32
    return %c0_i32, %c0_i32_0 : i32, i32
  }
  func.func @transform_3(%arg0: i32) -> (i32, i32, i32) {
    %c0_i32 = arith.constant 0 : i32
    %c0_i32_0 = arith.constant 0 : i32
    %c0_i32_1 = arith.constant 0 : i32
    return %arg0, %c0_i32, %c0_i32_0 : i32, i32, i32
  }
}

</mosaic_0001>

<bundles_post_ra>
// kernel: tpu_custom_call.1
= control target key start
LH: loop header
LB: loop body
LE: loop exit
PB: predicated region body
PF: predicated region fallthrough
CT: control target
= control target key end

     0   :  { %s828_s0 = inlined_call_operand.hbm [shape: f32[3], index: 0, kind: input, shape index: {}]   ;;  %s829_s1 = inlined_call_operand.hbm [shape: f32[2,16,256], index: 1, kind: input, shape index: {}]   ;;  %s830_s2 = inlined_call_operand.hbm [shape: f32[16,16], index: 2, kind: input, shape index: {}]   ;;  %s831_s3 = inlined_call_operand.hbm [shape: f32[2,1,16], index: 3, kind: output, shape index: {}]  }
   0x1   :  { %832 = sst [smem:[#allocation14_spill]] %s828_s0 }
   0x2   :  { %8 = vsyncpa [#allocation5], 0 }
   0x3   :  { %9 = vsyncpa [#allocation3], 0 }
   0x4   :  { %11 = vsyncpa [#allocation3 + $0x1], 0 }
   0x5   :  { %12 = vsyncpa [#allocation8], 0 }
   0x6   :  { %13 = vsyncpa [#allocation4], 0 }
   0x7   :  { %15 = vsyncpa [#allocation4 + $0x1], 0  ;;  %s678_s12 = smov 0   ;;  %s680_s13 = smov 0  }
   0x8   :  { %s682_s14 = smov 0   ;;  %s684_s15 = smov 0  }
   0x9 LB: > { %s699_s16 = sadd.s32 4294967295, %s650_s15   ;;  %s407_s17 = sadd.s32 4294967294, %s650_s15   ;;  %s650_s15 = sphi %s684_s15, %s844_s15   ;;  %s646_s14 = sphi %s682_s14, %s843_s14   ;;  %s642_s13 = sphi %s680_s13, %s842_s13   ;;  %s638_s12 = sphi %s678_s12, %s841_s12  }
   0xa   : > { %s703_s18 = sadd.s32 1, %s650_s15   ;;  %s49_s19 = sadd.s32 1, %s646_s14 }
   0xb   : > { %s46_s20 = ssub.s32 %s650_s15, %s703_s18  ;;  %p56_p0 = scmp.ne.s32.totalorder %s646_s14, %s642_s13 }
   0xc   : > { %p47_p1 = scmp.eq.s32.totalorder %s46_s20, 0  ;;  %p57_p2 = scmp.eq.s32.totalorder %s650_s15, 0 }
   0xd   : > { %p62_p3 = scmp.ne.s32.totalorder %s642_s13, %s638_s12  ;;  %p63_p4 = scmp.eq.s32.totalorder %s699_s16, 0 }
   0xe   : > { %s715_s21 = scalar_select %p47_p1, %s646_s14, %s49_s19  }
   0xf   : > { %p717_p5 = por %p57_p2, %p56_p0  ;;  %p723_p6 = por %p63_p4, %p62_p3 }
  0x10   : > { %p107_p7 = scmp.eq.s32.totalorder %s699_s16, 1  ;;  %p113_p8 = scmp.eq.s32.totalorder %s407_s17, 1 }
  0x11   : > { %p408_p9 = scmp.ge.s32.totalorder %s650_s15, 1  ;;  %p120_p10 = scmp.lt.s32.totalorder %s650_s15, 3 }
  0x12   : > { %p730_p11 = por %p107_p7, %p56_p0  ;;  %p734_p12 = por %p113_p8, %p62_p3 }
  0x13   : > { %p738_p13 = pnand %p408_p9, %p120_p10  ;;  %s838_s0 = sld [smem:[#allocation14_spill]] }
  0x14   : > { %p455_p2 = scmp.lt.s32.totalorder %s650_s15, 2  ;;  %s141_s5 = sshll.u32 %s830_s2, 4  ;;  %s142_s5 = int_to_ptr.hbm [resolvable:$true] %s141_s5 }
  0x15   : > { %p438_p1 = pneg %p738_p13  ;;  %s652_s7 = smov [#allocation2]  }
  0x16   : > { %p756_p7 = pnand %p455_p2, %p717_p5  ;;  %s653_s8 = smov [#allocation7]  }
  0x17   : > { %p439_p3 = pnand %p438_p1, %p63_p4  ;;  %s143_s9 = sshll.u32 %s653_s8, 4  ;;  %s144_s9 = int_to_ptr.vmem [resolvable:$true] %s143_s9 }
  0x18   : > { %s157_s10 = sand.u32 1, %s646_s14   ;;  %s654_s11 = smov 128  }
  0x19   : > { %s132_s29 = sshll.u32 %s838_s0, 4  ;;  %s655_s17 = smov 8   ;;  %s133_s29 = int_to_ptr.hbm [resolvable:$true] %s132_s29 }
  0x1a   : > { %441 = dma.hbm_to_smem (!%p439_p3), %s133_s29, 16, %s652_s7, [#allocation5]  }
  0x1b   : > { %444 = dma.hbm_to_vmem [thread:$0]  (!%p439_p3), %s142_s5, 256, %s144_s9, [#allocation8], %s654_s11, %s654_s11, %s655_s17  }
  0x1c   : > { %s412_s19 = sshll.u32 %s157_s10, 5  ;;  %s425_s20 = sshll.u32 %s650_s15, 5 }
  0x1d   : > { %s166_s22 = scalar_lea.hbm %s829_s1, %s425_s20  ;;  %s161_s30 = scalar_lea.vmem [#allocation6], %s412_s19 }
  0x1e   : > { %s169_s4 = sshll.u32 %s161_s30, 4  ;;  %s167_s0 = sshll.u32 %s166_s22, 4  ;;  %s170_s4 = int_to_ptr.vmem [resolvable:$true] %s169_s4  ;;  %s168_s0 = int_to_ptr.hbm [resolvable:$true] %s167_s0 }
  0x1f   : > { %s158_s29 = scalar_lea.sflag [#allocation3], %s157_s10  ;;  %s546_s7 = sshra.s32 %s168_s0, 4  ;;  %s547_s7 = int_to_ptr.hbm [resolvable:$true] %s546_s7 }
  0x20   : > { %s548_s8 = scalar_lea.hbm %s547_s7, 32  ;;  %p550_p8 = pneg %p756_p7 }
  0x21   : > { %p549_p5 = scmp.ne.s32.totalorder %s547_s7, %s548_s8  ;;  %s553_s11 = scalar_lea.hbm %s829_s1, 64 }
  0x22   : > { %p554_p1 = scmp.lt.s32.totalorder %s547_s7, %s829_s1  ;;  %p555_p2 = scmp.lt.s32.totalorder %s553_s11, %s548_s8 }
  0x23   : > { %p551_p9 = pnand %p550_p8, %p549_p5 }
  0x24   : > { %p556_p3 = por %p555_p2, %p554_p1 }
  0x25   : > { %p552_p10 = pneg %p551_p9 }
  0x27   : > { %p557_p0 = pnand %p556_p3, %p552_p10 }
  0x29   : > { %560 = shalt.err (!%p557_p0)
}
  0x2a   : > { %s656_s10 = smov 256   ;;  %s657_s19 = smov 16  }
  0x2b   : > { %448 = dma.hbm_to_vmem [thread:$0]  (!%p756_p7), %s168_s0, 512, %s170_s4, %s158_s29, %s656_s10, %s656_s10, %s657_s19  }
  0x2c   : > { %181 = sbr.rel (%p738_p13) target bundleno = 353 (0x161), region = 32 }
  0x31   : > { %621 = dma.done.wait (%p63_p4), [#allocation5], 16  }
  0x32   : > { %623 = vsyncadd (%p63_p4), [#allocation5], 4294967280  ;;  %s782_s27 = sand.u32 1, %s642_s13  }
  0x33   : > { %s417_s28 = sshll.u32 %s782_s27, 5  ;;  %s189_s22 = scalar_lea.sflag [#allocation3], %s782_s27 }
  0x34   : > { %s192_s30 = scalar_lea.vmem [#allocation6], %s417_s28 }
  0x35   : > { %625 = dma.done.wait (%p723_p6), %s189_s22, 512  }
  0x36   : > { %627 = vsyncadd (%p723_p6), %s189_s22, 4294966784 }
  0x37   : > { %629 = dma.done.wait (%p63_p4), [#allocation8], 256  }
  0x38   : > { %631 = vsyncadd (%p63_p4), [#allocation8], 4294967040 }
  0x39   : > { %203 = sfence }
  0x3a   : > { %v221_v0 = vld [vmem:[%s192_s30] sm:$0xff]  ;;  %v222_v1 = vld [vmem:[%s192_s30 + $0x8] sm:$0xff]  ;;  %v223_v4 = vld [vmem:[%s192_s30 + $0x10] sm:$0xff]  ;;  %s239_s0 = sld [smem:[#allocation2]]  ;;  %v255_v15 = vlaneseq  ;;  %vm260_vm0 = vcmask 130112   ;;  %vm262_vm1 = vcmask 130048   ;;  %s315_s29 = scalar_lea.hbm %s831_s3, %s699_s16 }
  0x3b   : > { %v225_v2 = vadd.f32 %v222_v1, %v221_v0  ;;  %v233_v3 = vmax.f32 %v221_v0, %v222_v1  ;;  %v224_v5 = vld [vmem:[%s192_s30 + $0x18] sm:$0xff]  ;;  %v251_v8 = vld [vmem:[#allocation7 + $0x8] sm:$0xff]  ;;  %v250_v9 = vld [vmem:[#allocation7] sm:$0xff]  ;;  %s419_s23 = sld [smem:[#allocation2 + $0x1]]  ;;  %s220_s7 = scalar_lea.vmem [#allocation9], %s782_s27  ;;  %vm304_vm5 = vcmask 122880  }
  0x3c   : > { %v228_v6 = vadd.f32 %v224_v5, %v223_v4  ;;  %v236_v7 = vmax.f32 %v223_v4, %v224_v5  ;;  %279 = vmatpush.msra.mxu0 %v251_v8  ;;  %v256_v20 = vand.u32 127, %v255_v15  ;;  %s420_s26 = sld [smem:[#allocation2 + $0x2]]  ;;  %s317_s8 = sshll.u32 %s220_s7, 4  ;;  %s318_s8 = int_to_ptr.vmem [resolvable:$true] %s317_s8 }
  0x3d   : > { %226 = vadd.xlane.f32.xlu0 %v225_v2  ;;  %234 = vmax.xlane.f32.xlu1 %v233_v3  ;;  %s319_s5 = sshll.u32 %s315_s29, 4  ;;  %s307_s16 = scalar_lea.sflag [#allocation4], %s782_s27  ;;  %s320_s5 = int_to_ptr.hbm [resolvable:$true] %s319_s5 }
  0x3e   : > { %280 = vmatpush.msra.mxu0 %v250_v9  ;;  %v258_v25 = vadd.s32 4294967288, %v256_v20  ;;  %s590_s9 = sshra.s32 %s320_s5, 4  ;;  %s596_s10 = scalar_lea.hbm %s831_s3, 2  ;;  %s591_s9 = int_to_ptr.hbm [resolvable:$true] %s590_s9 }
  0x3f   : > { %s592_s11 = scalar_lea.hbm %s591_s9, 1  ;;  %p597_p0 = scmp.lt.s32.totalorder %s591_s9, %s831_s3 }
  0x40   : > { %v242_v13 = vstv %s239_s0  ;;  %p593_p4 = scmp.ne.s32.totalorder %s591_s9, %s592_s11  ;;  %p598_p7 = scmp.lt.s32.totalorder %s596_s10, %s592_s11 }
  0x41   : > { %v245_v14 = vstv %s419_s23 }
  0x42   : > { %v252_v30 = vstv %s420_s26  ;;  %p594_p6 = pnand %p593_p4, %p730_p11  ;;  %p599_p5 = por %p598_p7, %p597_p0 }
  0x44   : > { %p595_p13 = pneg %p594_p6 }
  0x45   : > { %229 = vadd.xlane.f32.xlu0 %v228_v6  ;;  %237 = vmax.xlane.f32.xlu1 %v236_v7 }
  0x46   : > { %p600_p8 = pnand %p599_p5, %p595_p13 }
  0xb0   : > { %v227_v10 = vpop.xlane.xlu0 %226  ;;  %v235_v11 = vpop.xlane.xlu1 %234 }
  0xb1   : > { %v231_v12 = vmul.f32 0.00390625, %v227_v10  ;;  %v246_v17 = vmul.f32 %v245_v14, %v235_v11 }
  0xb3   : > { %v243_v16 = vmul.f32 %v242_v13, %v231_v12 }
  0xb5   : > { %v248_v23 = vadd.f32 %v246_v17, %v243_v16 }
  0xb7   : > { %v257_v27 = vperm.slane %v248_v23, %v256_v20 }
  0xb8   : > { %v230_v18 = vpop.xlane.xlu0 %229  ;;  %v238_v19 = vpop.xlane.xlu1 %237 }
  0xb9   : > { %v232_v21 = vmul.f32 0.00390625, %v230_v18  ;;  %v247_v22 = vmul.f32 %v245_v14, %v238_v19 }
  0xbb   : > { %v244_v24 = vmul.f32 %v242_v13, %v232_v21 }
  0xbd   : > { %v249_v26 = vadd.f32 %v247_v22, %v244_v24 }
  0xbf   : > { %v259_v28 = vperm.slane %v249_v26, %v258_v25 }
  0xc1   : > { %v261_v29 = vsel %vm260_vm0, %v259_v28, %v257_v27 }
  0xc2   : > { %421 = vmatmul.msk.f32.vlgmr.msra.gmra.mxu0 %vm262_vm1, %v261_v29 }
 0x13f   : > { %v282_v31 = vpop.f32.mrf.mxu0 }
 0x140   : > { %v283_v32 = vadd.f32 %v282_v31, %v252_v30 }
 0x142   : > { %v422_v33 = vmul.f32 -1.442695, %v283_v32 }
 0x144   : > { %497 = vpow2.f32 %v422_v33 }
 0x14a   : > { %v498_v34 = vpop.eup %497 }
 0x14b   : > { %v288_v35 = vadd.f32 1.0, %v498_v34 }
 0x14d   : > { %499 = vrcp.f32 %v288_v35  ;;  %v300_v39 = vand.u32 2147483648, %v288_v35  ;;  %v298_v41 = vand.u32 2147483647, %v288_v35  ;;  %vm294_vm3 = vweird.f32 %v288_v35 }
 0x14f   : > { %v301_v43 = vor.u32 1.1754944e-38, %v300_v39  ;;  %vm299_vm6 = vcmp.eq.f32.partialorder %v298_v41, 8.507059e+37 }
 0x153   : > { %v500_v36 = vpop.eup %499 }
 0x154   : > { %v290_v37 = vmul.f32 %v500_v36, %v288_v35  ;;  %vm295_vm2 = vweird.f32 %v500_v36 }
 0x155   : > { %vm296_vm4 = vmor %vm294_vm3, %vm295_vm2 }
 0x156   : > { %v291_v38 = vsub.f32 1.0, %v290_v37 }
 0x158   : > { %v292_v40 = vmul.f32 %v500_v36, %v291_v38 }
 0x15a   : > { %v293_v42 = vadd.f32 %v500_v36, %v292_v40 }
 0x15c   : > { %v297_v44 = vsel %vm296_vm4, %v500_v36, %v293_v42 }
 0x15d   : > { %v302_v45 = vsel %vm299_vm6, %v301_v43, %v297_v44 }
 0x15e   : > { %305 = vst.msk [vmem:[%s220_s7] sm:$0x1] %vm304_vm5, %v302_v45 }
 0x15f   : > { %603 = shalt.err (!%p600_p8)
}
 0x160   : > { %436 = dma.vmem_to_hbm [thread:$0]  (%p730_p11), %s318_s8, 16, %s320_s5, %s307_s16  }
 0x161 PF: > { %s331_s27 = sand.u32 1, %s638_s12   ;;  %p840_p9 = scmp.ge.s32.totalorder %s650_s15, 2 }
 0x162   : > { %s332_s22 = scalar_lea.sflag [#allocation4], %s331_s27 }
 0x163   : > { %p450_p10 = pnand %p840_p9, %p734_p12 }
 0x165   : > { %p451_p1 = pneg %p450_p10 }
 0x167   : > { %633 = dma.done.wait (%p451_p1), %s332_s22, 16  }
 0x168   : > { %635 = vsyncadd (%p451_p1), %s332_s22, 4294967280  ;;  %p18_p2 = scmp.ge.s32.totalorder %s703_s18, 4   ;;  %s841_s12 = smov %s642_s13 }
 0x169   : > { %s842_s13 = smov %s646_s14  ;;  %s843_s14 = smov %s715_s21 }
 0x16a   : > { %s844_s15 = smov %s703_s18  ;;  %20 = sbr.rel (!%p18_p2) target bundleno = 9 (0x9), region = 86 }
 0x16f   :  { %337 = vsyncpa [#allocation3], 1 }
 0x170   :  { %339 = vsyncpa [#allocation3 + $0x1], 1 }
 0x171   :  { %340 = vsyncpa [#allocation8], 1 }
 0x172   :  { %341 = vsyncpa [#allocation4], 1 }
 0x173   :  { %343 = vsyncpa [#allocation4 + $0x1], 1 }
 0x174   :  { %344 = vsyncpa [#allocation5], 1 }
 0x175   :  { %346 = vsyncpa [#allocation5 + $0x1], 1 }

</bundles_post_ra>
